<compile_context>
chip_gen: v6e
topology: v6e:2x2x1
jax: 0.10.0
libtpu: 0.0.40
codegen_flags: <defaults>
</compile_context>

<pallas_src>
import functools

import jax
import jax.numpy as jnp
from jax import lax
from jax.experimental import pallas as pl
from jax.experimental.pallas import tpu as pltpu


def _round_up(v, m):
    return (v + m - 1) // m * m


def _softmax_exp_dtype():
    # bf16 exp roughly doubles EUP throughput on v6e/v7x; v5e/v4 EUP has no bf16.
    try:
        kind = jax.devices()[0].device_kind.lower()
    except Exception:
        return jnp.float32
    return jnp.bfloat16 if ("v6" in kind or "v7" in kind) else jnp.float32


# ----------------------- kernel 1: augmented linear --------------------------- #
def _linear_kernel(x_ref, w_ref, o_ref):
    # bf16 MXU operands, f32 accumulation, bf16 store (halves HBM writeback).
    o_ref[...] = jnp.dot(x_ref[...].astype(jnp.bfloat16),
                         w_ref[...].astype(jnp.bfloat16),
                         preferred_element_type=jnp.float32).astype(o_ref.dtype)


# ------------- kernel 2: flash-style attention + aggregation ------------------ #
def _gat_attn_kernel(a_srcT_ref, h_dst_ref, h_src_ref, adj_ref, bias_ref, out_ref,
                     m_sc, l_sc, acc_sc, *,
                     heads, f_out, concat, activation, negative_slope, exp_dtype):
    """One (destination tile, source tile) step of a GATConv layer.

    a_srcT_ref : [Hp, TS]    f32 source attention logits, pre-transposed (lane-major)
    h_dst_ref  : [TN, D_aug] bf16 transformed features + alpha columns (dst tile)
    h_src_ref  : [TS, D_aug] bf16 transformed features (source tile)
    adj_ref    : [TN, TS]    int8 adjacency mask (adj[i, j] = edge j -> i)
    bias_ref   : [1,  C]     layer bias (C = heads*f_out if concat else f_out)
    out_ref    : [TN, C_pad] output tile (lane-padded), written on last src tile
    m_sc/l_sc  : [TN, Hp]    f32 running max / running softmax denominator
    acc_sc     : [TN, heads*f_out] f32 per-head accumulator slabs
    """
    k = pl.program_id(1)
    nk = pl.num_programs(1)
    hf = heads * f_out
    acc_cols = hf if concat else f_out
    out_pad = out_ref.shape[-1]
    MASKED = jnp.float32(-3e38)   # "no edge" logit (exp underflows to 0 exactly)

    @pl.when(k == 0)
    def _init():
        m_sc[...] = jnp.full(m_sc.shape, -1e30, jnp.float32)
        l_sc[...] = jnp.zeros(l_sc.shape, jnp.float32)
        acc_sc[...] = jnp.zeros(acc_sc.shape, jnp.float32)

    # Head-invariant work (single compare; no f32 mask materialization).
    mask = adj_ref[...] > 0                                        # [TN, TS] bool
    a_dst = h_dst_ref[:, hf + heads:hf + 2 * heads].astype(jnp.float32)  # [TN, H]

    for h in range(heads):                                         # static, small
        # e[i, j] = LeakyReLU(alpha_dst[i] + alpha_src[j])  for edge j -> i
        a_src_row = a_srcT_ref[h:h + 1, :]                         # [1, TS] (no transpose)
        e = a_dst[:, h:h + 1] + a_src_row                          # [TN, TS]
        e = jnp.maximum(e, negative_slope * e)                     # LeakyReLU (2 VPU ops)
        e = jnp.where(mask, e, MASKED)                             # mask non-edges

        # Online softmax update over this source tile.
        m_old = m_sc[:, h:h + 1]
        m_new = jnp.maximum(m_old, jnp.max(e, axis=-1, keepdims=True))
        scale = jnp.exp(m_old - m_new)                             # [TN, 1]
        p = jnp.exp((e - m_new).astype(exp_dtype))                 # EUP (bf16 on v6e/v7x)
        p_sum = jnp.sum(p.astype(jnp.float32), axis=-1, keepdims=True)

        # Aggregate neighbour features on the MXU (bf16 operands, f32 acc).
        hh = h_src_ref[:, h * f_out:(h + 1) * f_out]               # [TS, f_out] bf16
        agg = jnp.dot(p.astype(jnp.bfloat16), hh,
                      preferred_element_type=jnp.float32)          # [TN, f_out]

        sl = slice(h * f_out, (h + 1) * f_out)
        m_sc[:, h:h + 1] = m_new
        l_sc[:, h:h + 1] = scale * l_sc[:, h:h + 1] + p_sum
        acc_sc[:, sl] = scale * acc_sc[:, sl] + agg

    @pl.when(k == nk - 1)
    def _finalize():
        y = None
        for h in range(heads):
            inv = pl.reciprocal(l_sc[:, h:h + 1], approx=False)    # exact divide
            yh = acc_sc[:, h * f_out:(h + 1) * f_out] * inv
            if concat:
                acc_sc[:, h * f_out:(h + 1) * f_out] = yh          # normalize in place
            else:
                y = yh if h == 0 else y + yh
        if concat:
            y = acc_sc[...]
        elif heads > 1:
            y = y * (1.0 / jnp.float32(heads))                     # mean over heads
        y = y + bias_ref[...]

        if activation == "elu":
            # min() keeps exp() off the (unselected) positive branch -> no inf.
            y = jnp.where(y > 0, y, jnp.exp(jnp.minimum(y, 0.0)) - 1.0)
        elif activation == "log_softmax":
            m2 = jnp.max(y, axis=-1, keepdims=True)
            lse = jnp.log(jnp.sum(jnp.exp(y - m2), axis=-1, keepdims=True)) + m2
            y = y - lse

        out_ref[:, 0:acc_cols] = y.astype(out_ref.dtype)
        if out_pad > acc_cols:                                     # zero the lane padding
            out_ref[:, acc_cols:out_pad] = jnp.zeros(
                (out_ref.shape[0], out_pad - acc_cols), out_ref.dtype)


# -------------------------------- one GATConv --------------------------------- #
def gat_conv(x, adj, w, att_src, att_dst, bias, *, heads, f_out, concat,
             activation, out_dtype, tn=256, ts=512, exp_dtype=jnp.float32):
    """One GATConv layer (+ fused activation) on a lane-padded dense graph.

    x   : [N_pad, F_in]  node features (N_pad a multiple of 128)
    adj : [N_pad, N_pad] int8 adjacency mask (row = destination)
    """
    n_pad, f_in_x = x.shape
    tn = min(tn, n_pad)
    ts = min(ts, n_pad)
    assert n_pad % tn == 0 and n_pad % ts == 0
    assert tn % 32 == 0 and ts % 128 == 0      # int8 adj sublane / lane tiling
    hf = heads * f_out
    acc_cols = hf if concat else f_out
    out_pad = _round_up(acc_cols, 128)

    # Fold the per-head attention projections into the weight matrix:
    #   w_aug = [ W | W_h @ a_src_h | W_h @ a_dst_h ]   (extra MXU columns)
    w_h = w.reshape(w.shape[0], heads, f_out)
    wa_src = jnp.einsum("ihf,hf->ih", w_h, att_src)
    wa_dst = jnp.einsum("ihf,hf->ih", w_h, att_dst)
    w_aug = jnp.concatenate([w, wa_src, wa_dst], axis=1)
    if f_in_x > w_aug.shape[0]:                # x may carry lane-padded zero columns
        w_aug = jnp.pad(w_aug, ((0, f_in_x - w_aug.shape[0]), (0, 0)))
    d_aug = _round_up(w_aug.shape[1], 128)
    w_aug = jnp.pad(w_aug, ((0, 0), (0, d_aug - w_aug.shape[1]))).astype(jnp.bfloat16)

    cp_lin = pltpu.CompilerParams(
        dimension_semantics=("parallel",),        # v7x: rows split across TensorCores
        vmem_limit_bytes=48 * 1024 * 1024)

    # 1) h_aug = x @ w_aug, tiled over node rows, stored in bf16.
    h_aug = pl.pallas_call(
        _linear_kernel,
        out_shape=jax.ShapeDtypeStruct((n_pad, d_aug), jnp.bfloat16),
        grid=(n_pad // tn,),
        in_specs=[pl.BlockSpec((tn, f_in_x), lambda i: (i, 0)),
                  pl.BlockSpec((f_in_x, d_aug), lambda i: (0, 0))],
        out_specs=pl.BlockSpec((tn, d_aug), lambda i: (i, 0)),
        compiler_params=cp_lin,
    )(x, w_aug)

    # Source attention logits, pre-transposed to lane-major [heads_pad, N_pad]
    # (hoists the per-head sublane->lane relayout out of the attention kernel).
    heads_pad = _round_up(heads, 8)
    a_srcT = jnp.transpose(h_aug[:, hf:hf + heads]).astype(jnp.float32)
    a_srcT = jnp.pad(a_srcT, ((0, heads_pad - heads), (0, 0)))

    bias2d = bias.reshape(1, acc_cols).astype(jnp.float32)

    # 2) flash-style attention + aggregation, tiled over (dst tiles, src tiles).
    kernel = functools.partial(
        _gat_attn_kernel, heads=heads, f_out=f_out, concat=concat,
        activation=activation, negative_slope=0.2, exp_dtype=exp_dtype)

    cp_attn = pltpu.CompilerParams(
        dimension_semantics=("parallel", "arbitrary"),
        vmem_limit_bytes=48 * 1024 * 1024)

    return pl.pallas_call(
        kernel,
        out_shape=jax.ShapeDtypeStruct((n_pad, out_pad), out_dtype),
        grid=(n_pad // tn, n_pad // ts),
        in_specs=[pl.BlockSpec((heads_pad, ts), lambda i, k: (0, k)),  # alpha_src^T
                  pl.BlockSpec((tn, d_aug), lambda i, k: (i, 0)),      # dst tile (bf16)
                  pl.BlockSpec((ts, d_aug), lambda i, k: (k, 0)),      # src tile (bf16)
                  pl.BlockSpec((tn, ts), lambda i, k: (i, k)),         # adj tile (int8)
                  pl.BlockSpec((1, acc_cols), lambda i, k: (0, 0))],   # bias
        out_specs=pl.BlockSpec((tn, out_pad), lambda i, k: (i, 0)),
        scratch_shapes=[pltpu.VMEM((tn, heads_pad), jnp.float32),      # running max
                        pltpu.VMEM((tn, heads_pad), jnp.float32),      # running denom
                        pltpu.VMEM((tn, hf), jnp.float32)],            # per-head acc slabs
        compiler_params=cp_attn,
    )(a_srcT, h_aug, h_aug, adj, bias2d)


# ------------------------------ full network ---------------------------------- #
def gat_net_forward(x, adj, params, *, tn=256, ts=512):
    """Full GAT_Net forward pass (eval mode).

    x: [N, F] node features, adj: [N, N] dense adjacency mask (row = destination).
    """
    n = x.shape[0]
    n_pad = _round_up(n, 128)

    # Lane-pad the node axis; padded nodes get a self-loop so their softmax rows
    # stay well defined (they are sliced off at the end).
    x_p = jnp.pad(x.astype(jnp.float32), ((0, n_pad - n), (0, 0)))
    adj_p = jnp.pad(adj.astype(jnp.float32), ((0, n_pad - n), (0, n_pad - n)))
    adj_p = jnp.maximum(adj_p, jnp.eye(n_pad, dtype=jnp.float32))  # self-loops
    adj_p = adj_p.astype(jnp.int8)           # mask only -> 1 byte per edge slot

    exp_dtype = _softmax_exp_dtype()
    p1, p2 = params["conv1"], params["conv2"]

    # F.dropout(eval) = identity.
    h = gat_conv(x_p, adj_p, p1["w"], p1["att_src"], p1["att_dst"], p1["bias"],
                 heads=p1["heads"], f_out=p1["f_out"], concat=True,
                 activation="elu", out_dtype=jnp.bfloat16,
                 tn=tn, ts=ts, exp_dtype=exp_dtype)

    # F.dropout(eval) = identity.  Class dim stays un-padded inside the compute.
    out = gat_conv(h, adj_p, p2["w"], p2["att_src"], p2["att_dst"], p2["bias"],
                   heads=p2["heads"], f_out=p2["f_out"], concat=False,
                   activation="log_softmax", out_dtype=jnp.float32,
                   tn=tn, ts=ts, exp_dtype=exp_dtype)
    return out[:n, :p2["f_out"]]


# --------------------------- parameter init ----------------------------------- #
def glorot(key, shape):
    fan_in, fan_out = shape[-2], shape[-1]
    lim = jnp.sqrt(6.0 / (fan_in + fan_out))
    return jax.random.uniform(key, shape, jnp.float32, -lim, lim)


def init_params(key, num_features, hidden, heads, output_heads, num_classes):
    ks = jax.random.split(key, 6)
    conv1 = dict(
        w=glorot(ks[0], (num_features, heads * hidden)),
        att_src=glorot(ks[1], (heads, hidden)),
        att_dst=glorot(ks[2], (heads, hidden)),
        bias=jnp.zeros((1, heads * hidden), jnp.float32),
        heads=heads, f_out=hidden,
    )
    conv2 = dict(
        w=glorot(ks[3], (heads * hidden, output_heads * num_classes)),
        att_src=glorot(ks[4], (output_heads, num_classes)),
        att_dst=glorot(ks[5], (output_heads, num_classes)),
        bias=jnp.zeros((1, num_classes), jnp.float32),
        heads=output_heads, f_out=num_classes,
    )
    return {"conv1": conv1, "conv2": conv2}


# ------------------------------- main ----------------------------------------- #
if __name__ == "__main__":
    # Small synthetic graph / config (mirrors dataset.num_features, args.hidden, ...)
    N_NODES = 200
    NUM_FEATURES = 16
    HIDDEN = 32
    HEADS = 4
    OUTPUT_HEADS = 1
    NUM_CLASSES = 8
    N_EDGES = 800

    key = jax.random.PRNGKey(0)
    k_x, k_src, k_dst, k_par = jax.random.split(key, 4)

    # data.x
    x = jax.random.normal(k_x, (N_NODES, NUM_FEATURES), jnp.float32)

    # data.edge_index ([2, E]: row 0 = src, row 1 = dst) -> dense adjacency mask.
    src = jax.random.randint(k_src, (N_EDGES,), 0, N_NODES)
    dst = jax.random.randint(k_dst, (N_EDGES,), 0, N_NODES)
    adj = jnp.zeros((N_NODES, N_NODES), jnp.float32).at[dst, src].set(1.0)
    adj = jnp.maximum(adj, jnp.eye(N_NODES, dtype=jnp.float32))  # add self-loops

    params = init_params(k_par, NUM_FEATURES, HIDDEN, HEADS, OUTPUT_HEADS, NUM_CLASSES)

    # tn=64 / ts=128 so both grid axes (dst tiles x src tiles) take >1 step at
    # this toy size, exercising the online-softmax reduction path.
    out = gat_net_forward(x, adj, params, tn=64, ts=128)
    out = jax.block_until_ready(out)

    assert out.shape == (N_NODES, NUM_CLASSES)
    assert bool(jnp.all(jnp.isfinite(out)))
    # log_softmax rows should sum (in prob space) to ~1
    assert bool(jnp.allclose(jnp.sum(jnp.exp(out), axis=1), 1.0, atol=1e-3))
    print("KERNEL_OK")
</pallas_src>

<mosaic_0001>
module attributes {stable_mosaic.version = 11 : i64} {
  func.func @_linear_kernel(%arg0: i32, %arg1: memref<64x16xf32, #tpu.memory_space<vmem>>, %arg2: memref<16x256xbf16, #tpu.memory_space<vmem>>, %arg3: memref<64x256xbf16, #tpu.memory_space<vmem>>) attributes {dimension_semantics = [#tpu.dimension_semantics<parallel>], iteration_bounds = array<i64: 4>, scalar_prefetch = 0 : i64, scratch_operands = 0 : i64, tpu.core_type = #tpu.core_type<tc>, window_params = [{transform_indices = @transform_0, window_bounds = array<i64: 64, 16>}, {pipeline_mode = #tpu.pipeline_mode<synchronous>, transform_indices = @transform_1, window_bounds = array<i64: 16, 256>}, {transform_indices = @transform_2, window_bounds = array<i64: 64, 256>}]} {
    %c0 = arith.constant 0 : index
    %c0_0 = arith.constant 0 : index
    %0 = vector.load %arg1[%c0, %c0_0] : memref<64x16xf32, #tpu.memory_space<vmem>>, vector<64x16xf32>
    %1 = arith.truncf %0 : vector<64x16xf32> to vector<64x16xbf16>
    %c0_1 = arith.constant 0 : index
    %c0_2 = arith.constant 0 : index
    %2 = vector.load %arg2[%c0_1, %c0_2] : memref<16x256xbf16, #tpu.memory_space<vmem>>, vector<16x256xbf16>
    %cst = arith.constant dense<0.000000e+00> : vector<64x256xf32>
    %3 = tpu.matmul %1, %2, %cst {dimension_numbers = #tpu.dot_dimension_numbers<[1], [0], [0], [1], [0, 0, 1, 1], [], []>} : vector<64x16xbf16>, vector<16x256xbf16>, vector<64x256xf32> -> vector<64x256xf32>
    %4 = arith.truncf %3 : vector<64x256xf32> to vector<64x256xbf16>
    %c0_3 = arith.constant 0 : index
    %c0_4 = arith.constant 0 : index
    %5 = vector.load %arg3[%c0_3, %c0_4] : memref<64x256xbf16, #tpu.memory_space<vmem>>, vector<64x256xbf16>
    tpu.vector_store %arg3[%c0_3, %c0_4], %4 {strides = array<i32>} : memref<64x256xbf16, #tpu.memory_space<vmem>>, vector<64x256xbf16>,
    return
  }
  func.func @transform_0(%arg0: i32) -> (i32, i32) {
    %c0_i32 = arith.constant 0 : i32
    %c0_i32_0 = arith.constant 0 : i32
    return %arg0, %c0_i32 : i32, i32
  }
  func.func @transform_1(%arg0: i32) -> (i32, i32) {
    %c0_i32 = arith.constant 0 : i32
    %c0_i32_0 = arith.constant 0 : i32
    %c0_i32_1 = arith.constant 0 : i32
    return %c0_i32, %c0_i32_0 : i32, i32
  }
  func.func @transform_2(%arg0: i32) -> (i32, i32) {
    %c0_i32 = arith.constant 0 : i32
    %c0_i32_0 = arith.constant 0 : i32
    return %arg0, %c0_i32 : i32, i32
  }
}

</mosaic_0001>

<bundles_post_ra>
// kernel: tpu_custom_call.1
= control target key start
LH: loop header
LB: loop body
LE: loop exit
PB: predicated region body
PF: predicated region fallthrough
CT: control target
= control target key end

     0   :  { %7 = vsyncpa [#allocation3], 0  ;;  %s669_s0 = inlined_call_operand.vmem [shape: f32[256,16], index: 0, kind: input, shape index: {}]   ;;  %s670_s1 = inlined_call_operand.vmem [shape: bf16[16,256], index: 1, kind: input, shape index: {}]   ;;  %s671_s2 = inlined_call_operand.hbm [shape: bf16[256,256], index: 2, kind: output, shape index: {}]  }
   0x1   :  { %9 = vsyncpa [#allocation3 + $0x1], 0  ;;  %s554_s9 = smov 0   ;;  %s556_s10 = smov 0  }
   0x2   :  { %s558_s11 = smov 0   ;;  %s560_s12 = smov 0  }
   0x3 LB: > { %s575_s13 = sadd.s32 4294967295, %s533_s12   ;;  %s389_s14 = sadd.s32 4294967294, %s533_s12   ;;  %s533_s12 = sphi %s560_s12, %s677_s12   ;;  %s529_s11 = sphi %s558_s11, %s676_s11   ;;  %s525_s10 = sphi %s556_s10, %s675_s10   ;;  %s521_s9 = sphi %s554_s9, %s674_s9  }
   0x4   : > { %s579_s15 = sadd.s32 1, %s533_s12   ;;  %s69_s16 = sadd.s32 1, %s529_s11 }
   0x5   : > { %s66_s17 = ssub.s32 %s533_s12, %s579_s15  ;;  %p79_p0 = scmp.ne.s32.totalorder %s529_s11, %s525_s10 }
   0x6   : > { %p67_p1 = scmp.eq.s32.totalorder %s66_s17, 0  ;;  %p80_p2 = scmp.eq.s32.totalorder %s575_s13, 3 }
   0x7   : > { %p85_p3 = scmp.ne.s32.totalorder %s525_s10, %s521_s9  ;;  %p86_p4 = scmp.eq.s32.totalorder %s389_s14, 3 }
   0x8   : > { %s590_s18 = scalar_select %p67_p1, %s529_s11, %s69_s16  }
   0x9   : > { %p592_p5 = por %p80_p2, %p79_p0  ;;  %p596_p6 = por %p86_p4, %p85_p3 }
   0xa   : > { %p392_p7 = scmp.ge.s32.totalorder %s533_s12, 1  ;;  %p116_p8 = scmp.lt.s32.totalorder %s533_s12, 5 }
   0xc   : > { %p117_p9 = pnand %p392_p7, %p116_p8 }
   0xd   : > { %s394_s23 = sshll.u32 (!%p117_p9), %s575_s13, 3  ;;  %s135_s30 = sand.u32 (!%p117_p9), 1, %s525_s10  }
   0xe   : > { %120 = sbr.rel (%p117_p9) target bundleno = 249 (0xf9), region = 28  ;;  %p139_p10 = scmp.lt.s32.totalorder (!%p117_p9), %s394_s23, 31 }
   0xf   : > { %s393_s3 = sshll.u32 (!%p117_p9), %s135_s30, 6  ;;  %s425_s5 = sshll.u32 (!%p117_p9), %s575_s13, 10 }
  0x10   : > { %s137_s4 = scalar_lea.vmem (!%p117_p9), [#allocation2], %s393_s3  ;;  %s623_s14 = scalar_lea.hbm (!%p117_p9), %s671_s2, %s425_s5 }
  0x11   : > { %s327_s6 = sshll.u32 (!%p117_p9), %s137_s4, 4  ;;  %s629_s13 = scalar_lea.sflag (!%p117_p9), [#allocation3], %s135_s30  ;;  %s625_s6 = int_to_ptr.vmem [resolvable:$true] %s327_s6 }
  0x12   : > { %s473_s16 = scalar_lea.vmem (!%p117_p9), %s625_s6, 1024  ;;  %s536_s17 = smov (!%p117_p9), [#allocation2]  }
  0x13   : > { %v470_v0 = vld [vmem:[%s670_s1 + $0x4] ss:$8 sps:$4 sm:$0xff]   ;;  %v472_v1 = vld [vmem:[%s670_s1] ss:$8 sps:$4 sm:$0xff]   ;;  %v535_v2 = vmov 0   ;;  %s679_s23 = smov (!%p139_p10, %s394_s23), 31  ;;  %p474_p11 = scmp.ne.s32.totalorder %s625_s6, %s473_s16 }
  0x14   : > { %215 = vmatprep.mubr.bf16.mxu0 %v535_v2  ;;  %235 = vmatprep.mubr.bf16.mxu1 %v535_v2  ;;  %s395_s26 = sshll.u32 %s679_s23, 3  ;;  %vm170_vm0 = vcmask 130048   ;;  %s477_s21 = sshll.u32 %s536_s17, 4  ;;  %s478_s21 = int_to_ptr.vmem [resolvable:$false] %s477_s21 }
  0x15   : > { %197 = vmatprep.subr.bf16.mxu0 %v470_v0  ;;  %426 = vmatprep.subr.bf16.mxu1 %v470_v0  ;;  %s142_s29 = scalar_lea.vmem %s669_s0, %s395_s26  ;;  %p475_p12 = pnand %p474_p11, %p592_p5 }
  0x16   : > { %198 = vmatpush1.bf16.msra.mxu0 %v472_v1  ;;  %427 = vmatpush1.bf16.msra.mxu1 %v472_v1  ;;  %v146_v3 = vld [vmem:[%s142_s29] sm:$0xff]  ;;  %v147_v4 = vld [vmem:[%s142_s29 + $0x8] sm:$0xff]  ;;  %v148_v9 = vld [vmem:[%s142_s29 + $0x10] sm:$0xff]  ;;  %s479_s22 = scalar_lea.vmem %s478_s21, 2048  ;;  %p480_p0 = scmp.lt.s32.totalorder %s625_s6, %s478_s21 }
  0x17   : > { %v150_v5 = vld [vmem:[%s142_s29 + $0x20] sm:$0xff]  ;;  %v154_v6 = vpack.c.bf16 %v147_v4, %v146_v3  ;;  %v151_v7 = vld [vmem:[%s142_s29 + $0x28] sm:$0xff]  ;;  %v149_v10 = vld [vmem:[%s142_s29 + $0x18] sm:$0xff]  ;;  %p476_p13 = pneg %p475_p12  ;;  %p481_p1 = scmp.lt.s32.totalorder %s479_s22, %s473_s16 }
  0x18   : > { %v156_v8 = vpack.c.bf16 %v151_v7, %v150_v5  ;;  %v152_v11 = vld [vmem:[%s142_s29 + $0x30] sm:$0xff]  ;;  %v153_v12 = vld [vmem:[%s142_s29 + $0x38] sm:$0xff]  ;;  %v155_v13 = vpack.c.bf16 %v149_v10, %v148_v9 }
  0x19   : > { %398 = vmatmul.mubr.msk.bf16.vlgmr.msra.gmra.mxu0 %vm170_vm0, %v154_v6  ;;  %v157_v14 = vpack.c.bf16 %v153_v12, %v152_v11  ;;  %p482_p2 = por %p481_p1, %p480_p0 }
  0x1a   : > { %400 = vmatmul.mubr.msk.bf16.vlgmr.msra.gmra.mxu1 %vm170_vm0, %v156_v8  ;;  %225 = vmatprep.mubr.bf16.mxu0 %v535_v2 }
  0x1b   : > { %245 = vmatprep.mubr.bf16.mxu1 %v535_v2  ;;  %p483_p3 = pnand %p482_p2, %p476_p13 }
  0x21   : > { %399 = vmatmul.mubr.msk.bf16.gmra.mxu0 %vm170_vm0, %v155_v13 }
  0x22   : > { %401 = vmatmul.mubr.msk.bf16.gmra.mxu1 %vm170_vm0, %v157_v14 }
  0xd9   : > { %v217_v15 = vpop.f32.mrf.mxu0 }
  0xda   : > { %v237_v16 = vpop.f32.mrf.mxu1 }
  0xdb   : > { %v219_v17 = vpop.f32.mrf.mxu0 }
  0xdc   : > { %v416_v18 = vpack.c.bf16 %v219_v17, %v217_v15  ;;  %v239_v19 = vpop.f32.mrf.mxu1 }
  0xdd   : > { %v420_v20 = vpack.c.bf16 %v239_v19, %v237_v16  ;;  %v221_v21 = vpop.f32.mrf.mxu0 }
  0xde   : > { %304 = vst [vmem:[%s137_s4] sm:$0xff] %v416_v18  ;;  %v241_v22 = vpop.f32.mrf.mxu1 }
  0xdf   : > { %308 = vst [vmem:[%s137_s4 + $0x20] sm:$0xff] %v420_v20  ;;  %v223_v23 = vpop.f32.mrf.mxu0 }
  0xe0   : > { %v417_v24 = vpack.c.bf16 %v223_v23, %v221_v21  ;;  %v243_v25 = vpop.f32.mrf.mxu1 }
  0xe1   : > { %v421_v26 = vpack.c.bf16 %v243_v25, %v241_v22  ;;  %v227_v27 = vpop.f32.mrf.mxu0 }
  0xe2   : > { %305 = vst [vmem:[%s137_s4 + $0x8] sm:$0xff] %v417_v24  ;;  %v247_v28 = vpop.f32.mrf.mxu1 }
  0xe3   : > { %309 = vst [vmem:[%s137_s4 + $0x28] sm:$0xff] %v421_v26  ;;  %v229_v29 = vpop.f32.mrf.mxu0 }
  0xe4   : > { %v418_v30 = vpack.c.bf16 %v229_v29, %v227_v27  ;;  %v249_v31 = vpop.f32.mrf.mxu1 }
  0xe5   : > { %v422_v32 = vpack.c.bf16 %v249_v31, %v247_v28  ;;  %v231_v33 = vpop.f32.mrf.mxu0 }
  0xe6   : > { %306 = vst [vmem:[%s137_s4 + $0x10] sm:$0xff] %v418_v30  ;;  %v251_v34 = vpop.f32.mrf.mxu1 }
  0xe7   : > { %310 = vst [vmem:[%s137_s4 + $0x30] sm:$0xff] %v422_v32  ;;  %v233_v35 = vpop.f32.mrf.mxu0 }
  0xe8   : > { %v419_v36 = vpack.c.bf16 %v233_v35, %v231_v33  ;;  %v253_v37 = vpop.f32.mrf.mxu1 }
  0xe9   : > { %v423_v38 = vpack.c.bf16 %v253_v37, %v251_v34 }
  0xea   : > { %307 = vst [vmem:[%s137_s4 + $0x18] sm:$0xff] %v419_v36 }
  0xeb   : > { %311 = vst [vmem:[%s137_s4 + $0x38] sm:$0xff] %v423_v38 }
  0xec   : > { %486 = shalt.err (!%p483_p3)
}
  0xed   : > { %s487_s23 = scalar_lea.hbm %s623_s14, 1024  ;;  %s491_s26 = scalar_lea.hbm %s671_s2, 4096 }
  0xee   : > { %p488_p4 = scmp.ne.s32.totalorder %s623_s14, %s487_s23  ;;  %p492_p9 = scmp.lt.s32.totalorder %s623_s14, %s671_s2 }
  0xef   : > { %p493_p10 = scmp.lt.s32.totalorder %s491_s26, %s487_s23 }
  0xf0   : > { %p489_p7 = pnand %p488_p4, %p592_p5 }
  0xf1   : > { %p494_p11 = por %p493_p10, %p492_p9 }
  0xf2   : > { %p490_p8 = pneg %p489_p7 }
  0xf4   : > { %p495_p12 = pnand %p494_p11, %p490_p8 }
  0xf6   : > { %498 = shalt.err (!%p495_p12)
}
  0xf7   : > { %s537_s29 = smov 128   ;;  %s538_s30 = smov 8  }
  0xf8   : > { %428 = dma.vmem_to_hbm [thread:$0]  (%p592_p5), %s625_s6, 1024, %s623_s14, %s629_s13, %s537_s29, %s537_s29, %s538_s30  }
  0xf9 PF: > { %p434_p13 = scmp.ge.s32.totalorder %s533_s12, 2  ;;  %s342_s3 = sand.u32 1, %s521_s9  }
  0xfa   : > { %s343_s4 = scalar_lea.sflag [#allocation3], %s342_s3 }
  0xfb   : > { %p431_p0 = pnand %p434_p13, %p596_p6 }
  0xfd   : > { %p432_p1 = pneg %p431_p0 }
  0xff   : > { %516 = dma.done.wait (%p432_p1), %s343_s4, 1024  }
 0x100   : > { %518 = vsyncadd (%p432_p1), %s343_s4, 4294966272  ;;  %p12_p2 = scmp.ge.s32.totalorder %s579_s15, 6   ;;  %s674_s9 = smov %s525_s10 }
 0x101   : > { %s675_s10 = smov %s529_s11  ;;  %s676_s11 = smov %s590_s18 }
 0x102   : > { %s677_s12 = smov %s579_s15  ;;  %14 = sbr.rel (!%p12_p2) target bundleno = 3 (0x3), region = 63 }
 0x107   :  { %348 = vsyncpa [#allocation3], 1 }
 0x108   :  { %350 = vsyncpa [#allocation3 + $0x1], 1 }

</bundles_post_ra>
